<compile_context>
chip_gen: v7x
topology: tpu7x:2x2x1
jax: 0.10.0
libtpu: 0.0.40
codegen_flags: <defaults>
</compile_context>

<pallas_src>
import functools

import jax
import jax.numpy as jnp
from jax.experimental import pallas as pl
from jax.experimental.pallas import tpu as pltpu


def _round_up(v, m):
    return ((v + m - 1) // m) * m


def gated_head_kernel(x_ref, w12_ref, b12_ref, w2_ref, b2_ref, o_ref):
    # w2_ref is (H_pad, O_pad); the h12 split point is H_pad (128-aligned).
    h_pad = w2_ref.shape[0]

    x = x_ref[...]
    w12 = w12_ref[...]

    # Fused projection: (TB, 2*H_pad) = x @ [W1 | Wg], bf16 operands,
    # f32 MXU accumulation; bias add in f32.
    h12 = jnp.dot(x.astype(w12.dtype), w12, preferred_element_type=jnp.float32)
    h12 = h12 + b12_ref[...]

    # h1 = relu(first half), gate = sigmoid(second half) -- all in f32
    # (VPU/EUP work is free filler under MXU slack; v5e has no bf16 VPU/EUP).
    h1 = jnp.maximum(h12[:, :h_pad], 0.0)
    g = jax.nn.sigmoid(h12[:, h_pad:])
    h = h1 * g

    # out = (h1 * gate) @ W2 + b2  (W2/b2 pre-padded to lane-dense O_pad).
    w2 = w2_ref[...]
    out = jnp.dot(h.astype(w2.dtype), w2, preferred_element_type=jnp.float32)
    out = out + b2_ref[...]
    o_ref[...] = out.astype(o_ref.dtype)


def prepare_gated_head_params(w1, b1, wg, bg, w2, b2,
                              matmul_dtype=jnp.bfloat16):
    """One-time host-side layout prep (fuse / pad / cast).

    Do this at parameter-init time and reuse the result every forward pass --
    it is a full weight-sized read+write and must not sit on the per-call path.
    """
    w1 = jnp.asarray(w1)
    wg = jnp.asarray(wg)
    w2 = jnp.asarray(w2)
    # Defensive bias reshape: accept (H,), (1,H), (O,), (1,O).
    b1 = jnp.asarray(b1).reshape(1, -1)
    bg = jnp.asarray(bg).reshape(1, -1)
    b2 = jnp.asarray(b2).reshape(1, -1)

    D, H = w1.shape
    O = w2.shape[1]
    H_pad = _round_up(H, 128)
    O_pad = _round_up(O, 128)

    # Pad hidden dim to a lane-tile multiple.  Zero padding is numerically
    # inert: padded columns give relu(0)=0 so the gated hidden is 0 there,
    # and the matching (zero-padded) W2 rows contribute nothing either.
    w1p = jnp.pad(w1, ((0, 0), (0, H_pad - H)))
    wgp = jnp.pad(wg, ((0, 0), (0, H_pad - H)))
    b1p = jnp.pad(b1, ((0, 0), (0, H_pad - H)))
    bgp = jnp.pad(bg, ((0, 0), (0, H_pad - H)))

    # Fuse the two x-projections: [W1 | Wg] -> (D, 2*H_pad).
    w12 = jnp.concatenate([w1p, wgp], axis=1).astype(matmul_dtype)
    b12 = jnp.concatenate([b1p, bgp], axis=1).astype(jnp.float32)

    # Lane-dense output: pad O up to a multiple of 128 with zero columns;
    # pad W2 rows up to H_pad with zeros.
    w2p = jnp.pad(w2, ((0, H_pad - H), (0, O_pad - O))).astype(matmul_dtype)
    b2p = jnp.pad(b2, ((0, 0), (0, O_pad - O))).astype(jnp.float32)

    return {
        "w12": w12, "b12": b12, "w2": w2p, "b2": b2p,
        "D": D, "H_pad": H_pad, "O": O, "O_pad": O_pad,
    }


def gated_head_forward(x, params, *, tb=256, keep_padded=False):
    """Forward pass using prepared params (see prepare_gated_head_params)."""
    B, D = x.shape
    assert D == params["D"]
    H_pad = params["H_pad"]
    O = params["O"]
    O_pad = params["O_pad"]
    w12, b12, w2p, b2p = params["w12"], params["b12"], params["w2"], params["b2"]

    # ---- batch tiling -----------------------------------------------------
    # Sublane-aligned (multiple of 8), capped at `tb`; if the grid would have
    # a single step but the batch can be split, halve the tile so the
    # "parallel" axis gives both v7x TensorCores work.
    B_sub = _round_up(B, 8)
    TB = min(tb, B_sub)
    if B_sub // TB < 2 and B_sub >= 16:
        TB = _round_up(pl.cdiv(B_sub, 2), 8)
    B_pad = _round_up(B_sub, TB)
    xp = jnp.pad(x, ((0, B_pad - B), (0, 0))) if B_pad != B else x
    grid = (B_pad // TB,)

    x_isz = xp.dtype.itemsize
    w_isz = w12.dtype.itemsize

    # ---- VMEM budget (footprint + ~30% headroom, clamped to 64 MiB) -------
    vmem_bytes = (
        2 * TB * D * x_isz                      # x tile (double-buffered)
        + 2 * TB * O_pad * x_isz                # out tile (double-buffered)
        + D * 2 * H_pad * w_isz                 # fused W1|Wg (Buffered(1))
        + H_pad * O_pad * w_isz                 # W2 padded   (Buffered(1))
        + (2 * H_pad + O_pad) * 4               # biases (f32)
        + TB * 2 * H_pad * 4                    # h12 intermediate (f32)
        + TB * H_pad * (4 + w_isz)              # gated hidden f32 + bf16 cast
    )
    vmem_limit = min(max(int(vmem_bytes * 1.3), 16 * 1024 * 1024),
                     64 * 1024 * 1024)

    # ---- advisory cost estimate -------------------------------------------
    flops = 2 * B_pad * D * (2 * H_pad) + 2 * B_pad * H_pad * O_pad
    bytes_accessed = (
        B_pad * D * x_isz
        + D * 2 * H_pad * w_isz + 2 * H_pad * 4
        + H_pad * O_pad * w_isz + O_pad * 4
        + B_pad * O_pad * x_isz
    )
    cost = pl.CostEstimate(flops=flops, transcendentals=B_pad * H_pad,
                           bytes_accessed=bytes_accessed)

    resident = functools.partial(pl.BlockSpec, pipeline_mode=pl.Buffered(1))

    out = pl.pallas_call(
        gated_head_kernel,
        out_shape=jax.ShapeDtypeStruct((B_pad, O_pad), x.dtype),
        grid=grid,
        in_specs=[
            pl.BlockSpec((TB, D), lambda i: (i, 0)),          # x (pipelined)
            resident((D, 2 * H_pad), lambda i: (0, 0)),       # W1|Wg resident
            resident((1, 2 * H_pad), lambda i: (0, 0)),       # b1|bg resident
            resident((H_pad, O_pad), lambda i: (0, 0)),       # W2 resident
            resident((1, O_pad), lambda i: (0, 0)),           # b2 resident
        ],
        out_specs=pl.BlockSpec((TB, O_pad), lambda i: (i, 0)),
        compiler_params=pltpu.CompilerParams(
            dimension_semantics=("parallel",),
            vmem_limit_bytes=vmem_limit,
        ),
        cost_estimate=cost,
    )(xp, w12, b12, w2p, b2p)

    if keep_padded:
        # Hand the lane-dense padded slab to the consumer; skip the de-pad copy.
        return out
    return out[:B, :O]


def gated_classifier_head(x, w1, b1, wg, bg, w2, b2, *, tb=256,
                          matmul_dtype=jnp.bfloat16):
    """Convenience one-shot wrapper (fuses params on the fly)."""
    params = prepare_gated_head_params(w1, b1, wg, bg, w2, b2,
                                       matmul_dtype=matmul_dtype)
    return gated_head_forward(x, params, tb=tb)


def reference(x, w1, b1, wg, bg, w2, b2):
    h1 = jax.nn.relu(x @ w1 + b1.reshape(1, -1))
    g = jax.nn.sigmoid(x @ wg + bg.reshape(1, -1))
    return (h1 * g) @ w2 + b2.reshape(1, -1)


if __name__ == "__main__":
    key = jax.random.PRNGKey(0)
    B, D, H, O = 16, 32, 32, 8  # batch, input_dim, hidden_dim, output_dim

    keys = jax.random.split(key, 7)
    x = jax.random.normal(keys[0], (B, D), dtype=jnp.float32)

    # Deterministic synthetic parameters (PyTorch-like uniform init scale).
    def uinit(k, shape, fan_in):
        bound = 1.0 / jnp.sqrt(fan_in)
        return jax.random.uniform(k, shape, jnp.float32, -bound, bound)

    w1 = uinit(keys[1], (D, H), D)
    b1 = uinit(keys[2], (H,), D)
    wg = uinit(keys[3], (D, H), D)
    bg = uinit(keys[4], (H,), D)
    w2 = uinit(keys[5], (H, O), H)
    b2 = uinit(keys[6], (O,), H)

    # Parameter prep is a one-time cost; reuse `params` across forward calls.
    params = prepare_gated_head_params(w1, b1, wg, bg, w2, b2)
    out = gated_head_forward(x, params)
    out = jax.block_until_ready(out)

    ref = reference(x, w1, b1, wg, bg, w2, b2)
    assert out.shape == (B, O)
    # bf16 MXU operands with f32 accumulation -> tolerance-level agreement.
    assert jnp.allclose(out, ref, atol=2e-2, rtol=2e-2), (
        float(jnp.max(jnp.abs(out - ref))))

    print("KERNEL_OK")
</pallas_src>

<mosaic_0001>
module attributes {stable_mosaic.version = 11 : i64} {
  func.func @gated_head_kernel(%arg0: i32, %arg1: memref<8x32xf32, #tpu.memory_space<vmem>>, %arg2: memref<32x256xbf16, #tpu.memory_space<vmem>>, %arg3: memref<1x256xf32, #tpu.memory_space<vmem>>, %arg4: memref<128x128xbf16, #tpu.memory_space<vmem>>, %arg5: memref<1x128xf32, #tpu.memory_space<vmem>>, %arg6: memref<8x128xf32, #tpu.memory_space<vmem>>) attributes {dimension_semantics = [#tpu.dimension_semantics<parallel>], iteration_bounds = array<i64: 2>, scalar_prefetch = 0 : i64, scratch_operands = 0 : i64, tpu.core_type = #tpu.core_type<tc>, window_params = [{transform_indices = @transform_0, window_bounds = array<i64: 8, 32>}, {pipeline_mode = #tpu.pipeline_mode<synchronous>, transform_indices = @transform_1, window_bounds = array<i64: 32, 256>}, {pipeline_mode = #tpu.pipeline_mode<synchronous>, transform_indices = @transform_2, window_bounds = array<i64: 1, 256>}, {pipeline_mode = #tpu.pipeline_mode<synchronous>, transform_indices = @transform_3, window_bounds = array<i64: 128, 128>}, {pipeline_mode = #tpu.pipeline_mode<synchronous>, transform_indices = @transform_4, window_bounds = array<i64: 1, 128>}, {transform_indices = @transform_5, window_bounds = array<i64: 8, 128>}]} {
    %c0 = arith.constant 0 : index
    %c0_0 = arith.constant 0 : index
    %0 = vector.load %arg1[%c0, %c0_0] : memref<8x32xf32, #tpu.memory_space<vmem>>, vector<8x32xf32>
    %c0_1 = arith.constant 0 : index
    %c0_2 = arith.constant 0 : index
    %1 = vector.load %arg2[%c0_1, %c0_2] : memref<32x256xbf16, #tpu.memory_space<vmem>>, vector<32x256xbf16>
    %2 = arith.truncf %0 : vector<8x32xf32> to vector<8x32xbf16>
    %cst = arith.constant dense<0.000000e+00> : vector<8x256xf32>
    %3 = tpu.matmul %2, %1, %cst {dimension_numbers = #tpu.dot_dimension_numbers<[1], [0], [0], [1], [0, 0, 1, 1], [], []>} : vector<8x32xbf16>, vector<32x256xbf16>, vector<8x256xf32> -> vector<8x256xf32>
    %c0_3 = arith.constant 0 : index
    %c0_4 = arith.constant 0 : index
    %4 = vector.load %arg3[%c0_3, %c0_4] : memref<1x256xf32, #tpu.memory_space<vmem>>, vector<1x256xf32>
    %5 = vector.broadcast %4 : vector<1x256xf32> to vector<8x256xf32>
    %6 = arith.addf %3, %5 : vector<8x256xf32>
    %7 = vector.extract_strided_slice %6 {offsets = [0, 0], sizes = [8, 128], strides = [1, 1]} : vector<8x256xf32> to vector<8x128xf32>
    %cst_5 = arith.constant 0.000000e+00 : f32
    %8 = vector.broadcast %cst_5 : f32 to vector<8x128xf32>
    %9 = arith.maximumf %7, %8 : vector<8x128xf32>
    %10 = vector.extract_strided_slice %6 {offsets = [0, 128], sizes = [8, 128], strides = [1, 1]} : vector<8x256xf32> to vector<8x128xf32>
    %11 = arith.negf %10 : vector<8x128xf32>
    %12 = math.exp %11 : vector<8x128xf32>
    %cst_6 = arith.constant 1.000000e+00 : f32
    %13 = vector.broadcast %cst_6 : f32 to vector<8x128xf32>
    %14 = arith.addf %13, %12 : vector<8x128xf32>
    %15 = arith.divf %13, %14 : vector<8x128xf32>
    %16 = arith.mulf %9, %15 : vector<8x128xf32>
    %c0_7 = arith.constant 0 : index
    %c0_8 = arith.constant 0 : index
    %17 = vector.load %arg4[%c0_7, %c0_8] : memref<128x128xbf16, #tpu.memory_space<vmem>>, vector<128x128xbf16>
    %18 = arith.truncf %16 : vector<8x128xf32> to vector<8x128xbf16>
    %cst_9 = arith.constant dense<0.000000e+00> : vector<8x128xf32>
    %19 = tpu.matmul %18, %17, %cst_9 {dimension_numbers = #tpu.dot_dimension_numbers<[1], [0], [0], [1], [0, 0, 1, 1], [], []>} : vector<8x128xbf16>, vector<128x128xbf16>, vector<8x128xf32> -> vector<8x128xf32>
    %c0_10 = arith.constant 0 : index
    %c0_11 = arith.constant 0 : index
    %20 = vector.load %arg5[%c0_10, %c0_11] : memref<1x128xf32, #tpu.memory_space<vmem>>, vector<1x128xf32>
    %21 = vector.broadcast %20 : vector<1x128xf32> to vector<8x128xf32>
    %22 = arith.addf %19, %21 : vector<8x128xf32>
    %c0_12 = arith.constant 0 : index
    %c0_13 = arith.constant 0 : index
    %23 = vector.load %arg6[%c0_12, %c0_13] : memref<8x128xf32, #tpu.memory_space<vmem>>, vector<8x128xf32>
    tpu.vector_store %arg6[%c0_12, %c0_13], %22 {strides = array<i32>} : memref<8x128xf32, #tpu.memory_space<vmem>>, vector<8x128xf32>,
    return
  }
  func.func @transform_0(%arg0: i32) -> (i32, i32) {
    %c0_i32 = arith.constant 0 : i32
    %c0_i32_0 = arith.constant 0 : i32
    return %arg0, %c0_i32 : i32, i32
  }
  func.func @transform_1(%arg0: i32) -> (i32, i32) {
    %c0_i32 = arith.constant 0 : i32
    %c0_i32_0 = arith.constant 0 : i32
    %c0_i32_1 = arith.constant 0 : i32
    return %c0_i32, %c0_i32_0 : i32, i32
  }
  func.func @transform_2(%arg0: i32) -> (i32, i32) {
    %c0_i32 = arith.constant 0 : i32
    %c0_i32_0 = arith.constant 0 : i32
    %c0_i32_1 = arith.constant 0 : i32
    return %c0_i32, %c0_i32_0 : i32, i32
  }
  func.func @transform_3(%arg0: i32) -> (i32, i32) {
    %c0_i32 = arith.constant 0 : i32
    %c0_i32_0 = arith.constant 0 : i32
    %c0_i32_1 = arith.constant 0 : i32
    return %c0_i32, %c0_i32_0 : i32, i32
  }
  func.func @transform_4(%arg0: i32) -> (i32, i32) {
    %c0_i32 = arith.constant 0 : i32
    %c0_i32_0 = arith.constant 0 : i32
    %c0_i32_1 = arith.constant 0 : i32
    return %c0_i32, %c0_i32_0 : i32, i32
  }
  func.func @transform_5(%arg0: i32) -> (i32, i32) {
    %c0_i32 = arith.constant 0 : i32
    %c0_i32_0 = arith.constant 0 : i32
    return %arg0, %c0_i32 : i32, i32
  }
}

</mosaic_0001>

<bundles_post_ra>
// kernel: tpu_custom_call.1
= control target key start
LH: loop header
LB: loop body
LE: loop exit
PB: predicated region body
PF: predicated region fallthrough
CT: control target
= control target key end

     0   :  { %10 = vsyncpa [#allocation3], 0  ;;  %s1167_s0 = inlined_call_operand.hbm [shape: f32[16,32], index: 0, kind: input, shape index: {}]   ;;  %s1168_s1 = inlined_call_operand.hbm [shape: bf16[32,256], index: 1, kind: input, shape index: {}]   ;;  %s1169_s2 = inlined_call_operand.vmem [shape: f32[1,256], index: 2, kind: input, shape index: {}]   ;;  %s1170_s3 = inlined_call_operand.hbm [shape: bf16[128,128], index: 3, kind: input, shape index: {}]   ;;  %s1171_s4 = inlined_call_operand.vmem [shape: f32[1,128], index: 4, kind: input, shape index: {}]   ;;  %s1172_s5 = inlined_call_operand.hbm [shape: f32[16,128], index: 5, kind: output, shape index: {}]  }
   0x1   :  { %12 = vsyncpa [#allocation3 + $0x1], 0 }
   0x2   :  { %13 = vsyncpa [#allocation6], 0 }
   0x3   :  { %14 = vsyncpa [#allocation4], 0 }
   0x4   :  { %16 = vsyncpa [#allocation4 + $0x1], 0  ;;  %s928_s18 = smov 0   ;;  %s930_s19 = smov 0  }
   0x5   :  { %s932_s20 = smov 0   ;;  %s934_s21 = smov 0  }
   0x6 LB: > { %s949_s22 = sadd.s32 4294967295, %s885_s21   ;;  %s577_s23 = sadd.s32 4294967294, %s885_s21   ;;  %s885_s21 = sphi %s934_s21, %s1192_s21   ;;  %s881_s20 = sphi %s932_s20, %s1191_s20   ;;  %s877_s19 = sphi %s930_s19, %s1190_s19   ;;  %s873_s18 = sphi %s928_s18, %s1189_s18  }
   0x7   : > { %p42_p0 = scmp.ne.s32.totalorder %s877_s19, %s873_s18  ;;  %p1173_p1 = scmp.eq.s32.totalorder %s949_s22, 0 }
   0x8   : > { %p156_p3 = scmp.eq.s32.totalorder %s577_s23, 1  ;;  %p578_p5 = scmp.ge.s32.totalorder %s885_s21, 1 }
   0x9   : > { %p958_p4 = por %p1173_p1, %p42_p0  ;;  %p163_p7 = scmp.lt.s32.totalorder %s885_s21, 3 }
   0xa   : > { %p963_p6 = por %p156_p3, %p42_p0  ;;  %s887_s27 = smov [#allocation5]  }
   0xb   : > { %s1176_s24 = scalar_select %p958_p4, 1, 0 }
   0xc   : > { %s1177_s25 = scalar_select %p963_p6, 1, 0 }
   0xd   : > { %p968_p8 = pnand %p578_p5, %p163_p7  ;;  %s175_s28 = sshll.u32 %s887_s27, 4  ;;  %s972_s28 = int_to_ptr.vmem [resolvable:$true] %s175_s28 }
   0xe   : > { %s888_s30 = smov [#allocation7]   ;;  %s729_s9 = scalar_lea.hbm %s1168_s1, 512 }
   0xf   : > { %p649_p9 = pneg %p968_p8  ;;  %s191_s6 = sshll.u32 %s888_s30, 4  ;;  %s983_s6 = int_to_ptr.vmem [resolvable:$true] %s191_s6 }
  0x10   : > { %p730_p12 = scmp.ne.s32.totalorder %s1168_s1, %s729_s9  ;;  %p736_p5 = scmp.lt.u32.totalorder %s729_s9, %s1168_s1 }
  0x11   : > { %p979_p11 = pnand %p649_p9, %p1173_p1 }
  0x13   : > { %p731_p13 = pneg %p979_p11 }
  0x15   : > { %p732_p0 = pnand %p731_p13, %p730_p12 }
  0x17   : > { %p733_p3 = pneg %p732_p0 }
  0x19   : > { %p738_p7 = pnand %p736_p5, %p733_p3 }
  0x1b   : > { %741 = shalt.err (!%p738_p7)
}
  0x1c   : > { %s742_s14 = scalar_lea.vmem %s972_s28, 512  ;;  %p750_p2 = scmp.lt.s32.totalorder %s972_s28, %s972_s28 }
  0x1d   : > { %p743_p9 = scmp.ne.s32.totalorder %s972_s28, %s742_s14  ;;  %p751_p12 = scmp.lt.s32.totalorder %s742_s14, %s742_s14 }
  0x1f   : > { %p745_p10 = pnand %p743_p9, %p731_p13  ;;  %p752_p0 = por %p751_p12, %p750_p2 }
  0x21   : > { %p746_p1 = pneg %p745_p10 }
  0x23   : > { %p753_p6 = pnand %p752_p0, %p746_p1 }
  0x25   : > { %756 = shalt.err (!%p753_p6)
}
  0x26   : > { %s889_s15 = smov 128   ;;  %s890_s16 = smov 8  }
  0x27   : > { %652 = dma.hbm_to_vmem [thread:$0]  (!%p979_p11), %s1168_s1, 512, %s972_s28, [#allocation6], %s889_s15, %s889_s15, %s890_s16  }
  0x28   : > { %s757_s7 = scalar_lea.hbm %s1170_s3, 1024 }
  0x29   : > { %p758_p2 = scmp.ne.s32.totalorder %s1170_s3, %s757_s7  ;;  %p764_p10 = scmp.lt.u32.totalorder %s757_s7, %s1170_s3 }
  0x2b   : > { %p760_p1 = pnand %p758_p2, %p731_p13 }
  0x2d   : > { %p761_p6 = pneg %p760_p1 }
  0x2f   : > { %p766_p3 = pnand %p764_p10, %p761_p6 }
  0x31   : > { %769 = shalt.err (!%p766_p3)
}
  0x32   : > { %s770_s28 = scalar_lea.vmem %s983_s6, 1024  ;;  %p778_p12 = scmp.lt.s32.totalorder %s983_s6, %s983_s6 }
  0x33   : > { %p771_p5 = scmp.ne.s32.totalorder %s983_s6, %s770_s28  ;;  %p779_p0 = scmp.lt.s32.totalorder %s770_s28, %s770_s28 }
  0x35   : > { %p773_p7 = pnand %p771_p5, %p731_p13  ;;  %p780_p2 = por %p779_p0, %p778_p12 }
  0x37   : > { %p774_p9 = pneg %p773_p7 }
  0x39   : > { %p781_p1 = pnand %p780_p2, %p774_p9 }
  0x3b   : > { %784 = shalt.err (!%p781_p1)
}
  0x3c   : > { %s891_s12 = smov 64   ;;  %s892_s13 = smov 4  }
  0x3d   : > { %655 = dma.hbm_to_vmem [thread:$0]  (!%p979_p11), %s1170_s3, 1024, %s983_s6, [#allocation6], %s891_s12, %s891_s12, %s892_s13  }
  0x3e   : > { %s1038_s16 = sadd.s32 1, %s885_s21   ;;  %s29_s23 = sadd.s32 1, %s881_s20 }
  0x3f   : > { %s26_s17 = ssub.s32 %s885_s21, %s1038_s16  ;;  %p36_p6 = scmp.ne.s32.totalorder %s881_s20, %s877_s19 }
  0x40   : > { %p27_p13 = scmp.eq.s32.totalorder %s26_s17, 0  ;;  %p37_p10 = scmp.eq.s32.totalorder %s885_s21, 0 }
  0x41   : > { %p1180_p5 = scmp.eq.s32.totalorder %s949_s22, 1  ;;  %p666_p9 = scmp.lt.s32.totalorder %s885_s21, 2 }
  0x42   : > { %s1047_s27 = scalar_select %p27_p13, %s881_s20, %s29_s23  }
  0x43   : > { %p38_p3 = por %p37_p10, %p36_p6  ;;  %p1051_p7 = por %p1180_p5, %p36_p6 }
  0x44   : > { %s208_s29 = sand.u32 1, %s881_s20   ;;  %s583_s6 = sshll.u32 %s885_s21, 7 }
  0x45   : > { %s1181_s30 = scalar_select %p1051_p7, 1, 0 }
  0x46   : > { %s582_s7 = sshll.u32 %s208_s29, 3  ;;  %s1061_s10 = scalar_lea.hbm %s1167_s0, %s583_s6 }
  0x47   : > { %s212_s11 = scalar_lea.vmem [#allocation2], %s582_s7  ;;  %p1065_p11 = pnand %p666_p9, %p38_p3 }
  0x48   : > { %s219_s28 = sshll.u32 %s212_s11, 4  ;;  %s209_s13 = scalar_lea.sflag [#allocation3], %s208_s29  ;;  %s1063_s28 = int_to_ptr.vmem [resolvable:$true] %s219_s28 }
  0x49   : > { %s785_s14 = scalar_lea.hbm %s1061_s10, 128  ;;  %p787_p0 = pneg %p1065_p11 }
  0x4a   : > { %p786_p12 = scmp.ne.s32.totalorder %s1061_s10, %s785_s14  ;;  %s790_s23 = scalar_lea.hbm %s1167_s0, 256 }
  0x4b   : > { %p791_p13 = scmp.lt.u32.totalorder %s1061_s10, %s1167_s0  ;;  %p792_p6 = scmp.lt.u32.totalorder %s790_s23, %s785_s14 }
  0x4c   : > { %p788_p2 = pnand %p787_p0, %p786_p12  ;;  %p794_p3 = scmp.lt.u32.totalorder %s785_s14, %s1061_s10 }
  0x4d   : > { %p793_p10 = por %p792_p6, %p791_p13 }
  0x4e   : > { %p789_p1 = pneg %p788_p2 }
  0x4f   : > { %p795_p5 = por %p794_p3, %p793_p10 }
  0x51   : > { %p796_p9 = pnand %p795_p5, %p789_p1 }
  0x53   : > { %799 = shalt.err (!%p796_p9)
}
  0x54   : > { %s800_s29 = scalar_lea.vmem %s1063_s28, 128  ;;  %s893_s8 = smov [#allocation2]  }
  0x55   : > { %p801_p12 = scmp.ne.s32.totalorder %s1063_s28, %s800_s29  ;;  %s805_s9 = sshll.u32 %s893_s8, 4  ;;  %s806_s9 = int_to_ptr.vmem [resolvable:$false] %s805_s9 }
  0x56   : > { %s807_s11 = scalar_lea.vmem %s806_s9, 256  ;;  %p808_p4 = scmp.lt.s32.totalorder %s1063_s28, %s806_s9 }
  0x57   : > { %p803_p2 = pnand %p801_p12, %p787_p0  ;;  %p809_p13 = scmp.lt.s32.totalorder %s807_s11, %s800_s29 }
  0x59   : > { %p804_p7 = pneg %p803_p2  ;;  %p810_p6 = por %p809_p13, %p808_p4 }
  0x5b   : > { %p811_p10 = pnand %p810_p6, %p804_p7 }
  0x5d   : > { %814 = shalt.err (!%p811_p10)
}
  0x5e   : > { %659 = dma.hbm_to_vmem [thread:$0]  (!%p1065_p11), %s1061_s10, 128, %s1063_s28, %s209_s13  }
  0x5f   : > { %228 = sbr.rel (%p968_p8) target bundleno = 588 (0x24c), region = 40  ;;  %s1097_s14 = sand.u32 (!%p968_p8), 1, %s877_s19  }
  0x60   : > { %s585_s15 = sshll.u32 (!%p968_p8), %s1097_s14, 3  ;;  %s231_s17 = scalar_lea.sflag (!%p968_p8), [#allocation3], %s1097_s14 }
  0x61   : > { %s234_s23 = scalar_lea.vmem (!%p968_p8), [#allocation2], %s585_s15  ;;  %p1183_p4 = scmp.ne.s32.totalorder (!%p968_p8), %s1176_s24, 0 }
  0x66   : > { %860 = dma.done.wait (%p1183_p4), %s231_s17, 128  }
  0x67   : > { %862 = vsyncadd (%p1183_p4), %s231_s17, 4294967168  ;;  %p1184_p7 = scmp.eq.s32.totalorder %s949_s22, 0 }
  0x69   : > { %864 = dma.done.wait (%p1184_p7), [#allocation6], 1536   ;;  %p1185_p8 = pmov %p1184_p7 }
  0x6a   : > { %v894_v0 = vmov 0   ;;  %v711_v1 = vld [vmem:[#allocation5 + $0x4] ss:$8 sps:$4 sm:$0xff]   ;;  %v713_v2 = vld [vmem:[#allocation5] ss:$8 sps:$4 sm:$0xff]   ;;  %v270_v5 = vld [vmem:[%s234_s23] sm:$0xff]  ;;  %v278_v16 = vlaneseq }
  0x6b   : > { %866 = vsyncadd (%p1185_p8), [#allocation6], 4294965760  ;;  %344 = vmatprep.mubr.bf16.mxu0 %v894_v0  ;;  %312 = vmatprep.subr.bf16.mxu0 %v711_v1  ;;  %v714_v3 = vld [vmem:[#allocation5 + $0x14] ss:$8 sps:$4 sm:$0xff]   ;;  %v716_v4 = vld [vmem:[#allocation5 + $0x10] ss:$8 sps:$4 sm:$0xff]   ;;  %v275_v6 = vpack.c.bf16 %v270_v5, %v270_v5 }
  0x6c   : > { %313 = vmatpush1.bf16.msra.mxu0 %v713_v2  ;;  %vm308_vm0 = vcmask 261120   ;;  %v717_v7 = vld [vmem:[#allocation7] sm:$0xff]   ;;  %v895_v8 = vmov 0.0   ;;  %v718_v9 = vld [vmem:[#allocation7 + $0x8] sm:$0xff]   ;;  %v719_v10 = vld [vmem:[#allocation7 + $0x10] sm:$0xff]   ;;  %vm896_vm1 = vmmov 0  }
  0x6d   : > { %314 = vmatprep.subr.bf16.mxu0 %v714_v3  ;;  %617 = vmatprep.subr.bf16.mxu1 %v895_v8  ;;  %v720_v11 = vld [vmem:[#allocation7 + $0x18] sm:$0xff]   ;;  %v721_v12 = vld [vmem:[#allocation7 + $0x20] sm:$0xff]   ;;  %v722_v13 = vld [vmem:[#allocation7 + $0x28] sm:$0xff]   ;;  %v279_v17 = vshrl.u32 %v278_v16, 7  ;;  %s605_s12 = sshll.u32 %s949_s22, 7  ;;  %s268_s13 = scalar_lea.vmem [#allocation8], %s585_s15 }
  0x6e   : > { %618 = vmatpush3.bf16.msra.mxu1 %v717_v7  ;;  %633 = vmatprep.mubr.msk.bf16.mxu1 %vm896_vm1, %v895_v8  ;;  %v723_v14 = vld [vmem:[#allocation7 + $0x30] sm:$0xff]   ;;  %v724_v15 = vld [vmem:[#allocation7 + $0x38] sm:$0xff]   ;;  %s488_s7 = sshll.u32 %s268_s13, 4  ;;  %s1123_s8 = scalar_lea.hbm %s1172_s5, %s605_s12  ;;  %s1125_s7 = int_to_ptr.vmem [resolvable:$true] %s488_s7 }
  0x6f   : > { %619 = vmatprep.subr.bf16.mxu1 %v895_v8  ;;  %v284_v18 = vsub.s32 1, %v279_v17  ;;  %v276_v19 = vld [vmem:[%s1169_s2] sm:$0x3]  ;;  %v280_v28 = vsub.s32 0, %v279_v17  ;;  %s475_s22 = scalar_lea.sflag [#allocation4], %s1097_s14  ;;  %s815_s9 = scalar_lea.vmem %s1125_s7, 128 }
  0x70   : > { %315 = vmatpush1.bf16.msra.mxu0 %v716_v4  ;;  %v595_v36 = vld [vmem:[%s1171_s4] ss:$0 sm:$0xff]  ;;  %p816_p11 = scmp.ne.s32.totalorder %s1125_s7, %s815_s9  ;;  %p1186_p0 = scmp.ne.s32.totalorder %s1181_s30, 0 }
  0x71   : > { %v285_v20 = vrot.slane %v276_v19, %v284_v18  ;;  %v281_v30 = vrot.slane %v276_v19, %v280_v28  ;;  %s897_s11 = smov [#allocation8]  }
  0x72   : > { %620 = vmatpush3.bf16.msra.mxu1 %v718_v9  ;;  %p817_p1 = pnand %p816_p11, %p1186_p0  ;;  %s819_s15 = sshll.u32 %s897_s11, 4  ;;  %s820_s15 = int_to_ptr.vmem [resolvable:$false] %s819_s15 }
  0x73   : > { %593 = vmatmul.mubr.msk.bf16.vlgmr.msra.gmra.mrb[0].mxu0 %vm308_vm0, %v275_v6  ;;  %621 = vmatprep.subr.bf16.mxu1 %v895_v8  ;;  %s821_s17 = scalar_lea.vmem %s820_s15, 256  ;;  %p822_p5 = scmp.lt.s32.totalorder %s1125_s7, %s820_s15 }
  0x74   : > { %p818_p3 = pneg %p817_p1  ;;  %p823_p9 = scmp.lt.s32.totalorder %s821_s17, %s815_s9 }
  0x76   : > { %622 = vmatpush3.bf16.msra.mxu1 %v719_v10  ;;  %p824_p12 = por %p823_p9, %p822_p5 }
  0x77   : > { %623 = vmatprep.subr.bf16.mxu1 %v895_v8 }
  0x78   : > { %p825_p2 = pnand %p824_p12, %p818_p3 }
  0x7a   : > { %624 = vmatpush3.bf16.msra.mxu1 %v720_v11 }
  0x7b   : > { %625 = vmatprep.subr.bf16.mxu1 %v895_v8 }
  0x7e   : > { %626 = vmatpush3.bf16.msra.mxu1 %v721_v12 }
  0x7f   : > { %627 = vmatprep.subr.bf16.mxu1 %v895_v8 }
  0x82   : > { %628 = vmatpush3.bf16.msra.mxu1 %v722_v13 }
  0x83   : > { %629 = vmatprep.subr.bf16.mxu1 %v895_v8 }
  0x86   : > { %630 = vmatpush3.bf16.msra.mxu1 %v723_v14 }
  0x87   : > { %631 = vmatprep.subr.bf16.mxu1 %v895_v8 }
  0x8a   : > { %632 = vmatpush3.bf16.msra.mxu1 %v724_v15 }
 0x146   : > { %v346_v21 = vpop.f32.mrb[0].mxu0 }
 0x147   : > { %v348_v22 = vpop.f32.mrb[1].mxu0  ;;  %v347_v31 = vadd.f32 %v346_v21, %v281_v30 }
 0x148   : > { %v349_v23 = vadd.f32 %v348_v22, %v285_v20  ;;  %v350_v24 = vpop.f32.mrb[2].mxu0 }
 0x149   : > { %v351_v25 = vpop.f32.mrb[3].mxu0  ;;  %v353_v32 = vmax.f32 %v347_v31, 0.0 }
 0x14a   : > { %v594_v26 = vmul.f32 -1.442695, %v349_v23 }
 0x14c   : > { %725 = vpow2.f32 %v594_v26 }
 0x156   : > { %v726_v27 = vpop.eup %725 }
 0x157   : > { %v357_v29 = vadd.f32 1.0, %v726_v27 }
 0x159   : > { %727 = vrcp.f32 %v357_v29 }
 0x163   : > { %v728_v33 = vpop.eup %727 }
 0x164   : > { %v360_v34 = vmul.f32 %v728_v33, %v353_v32 }
 0x166   : > { %v377_v35 = vpack.c.bf16 %v360_v34, %v360_v34 }
 0x168   : > { %634 = vmatmul.mubr.bf16.vlgmr.msra.gmra.mrb[0].mxu1 %v377_v35 }
 0x23b   : > { %v467_v37 = vpop.f32.mrb[0].mxu1 }
 0x23c   : > { %v468_v38 = vadd.f32 %v595_v36, %v467_v37  ;;  %v635_v39 = vpop.f32.mrb[1].mxu1 }
 0x23d   : > { %v470_v40 = vpop.f32.mrb[2].mxu1 }
 0x23e   : > { %473 = vst [vmem:[%s268_s13] sm:$0xff] %v468_v38  ;;  %v636_v41 = vpop.f32.mrb[3].mxu1 }
 0x23f   : > { %828 = shalt.err (!%p825_p2)
}
 0x240   : > { %s829_s14 = scalar_lea.hbm %s1123_s8, 128  ;;  %s833_s26 = scalar_lea.hbm %s1172_s5, 256 }
 0x241   : > { %p830_p13 = scmp.ne.s32.totalorder %s1123_s8, %s829_s14  ;;  %p834_p4 = scmp.lt.u32.totalorder %s1123_s8, %s1172_s5 }
 0x242   : > { %p835_p7 = scmp.lt.u32.totalorder %s833_s26, %s829_s14  ;;  %p837_p11 = scmp.lt.u32.totalorder %s829_s14, %s1123_s8 }
 0x243   : > { %p831_p6 = pnand %p830_p13, %p1186_p0 }
 0x244   : > { %p836_p8 = por %p835_p7, %p834_p4 }
 0x245   : > { %p832_p10 = pneg %p831_p6 }
 0x246   : > { %p838_p1 = por %p837_p11, %p836_p8 }
 0x248   : > { %p839_p3 = pnand %p838_p1, %p832_p10 }
 0x24a   : > { %842 = shalt.err (!%p839_p3)
}
 0x24b   : > { %647 = dma.vmem_to_hbm [thread:$0]  (%p1186_p0), %s1125_s7, 128, %s1123_s8, %s475_s22  }
 0x24c PF: > { %s500_s12 = sand.u32 1, %s873_s18   ;;  %p1187_p5 = scmp.ne.s32.totalorder %s1177_s25, 0 }
 0x24d   : > { %p1188_p9 = scmp.ge.s32.totalorder %s885_s21, 2  ;;  %s501_s13 = scalar_lea.sflag [#allocation4], %s500_s12 }
 0x24f   : > { %p661_p12 = pnand %p1188_p9, %p1187_p5 }
 0x251   : > { %868 = dma.done.wait (!%p661_p12), %s501_s13, 128  }
 0x252   : > { %870 = vsyncadd (!%p661_p12), %s501_s13, 4294967168  ;;  %p19_p2 = scmp.ge.s32.totalorder %s1038_s16, 4   ;;  %s1189_s18 = smov %s877_s19 }
 0x253   : > { %s1190_s19 = smov %s881_s20  ;;  %s1191_s20 = smov %s1047_s27 }
 0x254   : > { %s1192_s21 = smov %s1038_s16  ;;  %21 = sbr.rel (!%p19_p2) target bundleno = 6 (0x6), region = 93 }
 0x25b   :  { %506 = vsyncpa [#allocation3], 1 }
 0x25c   :  { %508 = vsyncpa [#allocation3 + $0x1], 1 }
 0x25d   :  { %509 = vsyncpa [#allocation6], 1 }
 0x25e   :  { %510 = vsyncpa [#allocation4], 1 }
 0x25f   :  { %512 = vsyncpa [#allocation4 + $0x1], 1 }

</bundles_post_ra>
